<compile_context>
chip_gen: v6e
topology: v6e:2x2x1
jax: 0.10.0
libtpu: 0.0.40
codegen_flags: <defaults>
</compile_context>

<pallas_src>
import functools
import math

import numpy as np

import jax
import jax.numpy as jnp
from jax.experimental import pallas as pl
from jax.experimental.pallas import tpu as pltpu


def _round_up(x, m):
    return ((x + m - 1) // m) * m


# ----------------------------------------------------------------------------
# Kernel 1: 1x1 conv (C -> 1) with fused bias, lane-dense output.
#   x_ref : (C, bm)   channels on sublanes, spatial on lanes
#   w_ref : (C, 1)
#   b_ref : (1,) in SMEM
#   o_ref : (1, bm)
# ----------------------------------------------------------------------------
def _conv1x1_to1_kernel(x_ref, w_ref, b_ref, o_ref):
    prod = x_ref[...] * w_ref[...]                         # (C, bm) * (C, 1)
    o_ref[...] = jnp.sum(prod, axis=0, keepdims=True) + b_ref[0]


def conv1x1_to1(x_nchw, w, b, *, bm=512):
    """NCHW (B, C, H, W) -> (B, 1, H, W): out = sum_c x[:,c]*w[c] + b."""
    B, C, H, W = x_nchw.shape
    M = H * W
    bm = min(bm, _round_up(M, 128))
    Mp = _round_up(M, bm)
    x = x_nchw.reshape(B, C, M).astype(jnp.float32)
    if Mp != M:
        x = jnp.pad(x, ((0, 0), (0, 0), (0, Mp - M)))
    w2 = w.reshape(C, 1).astype(jnp.float32)
    b1 = b.reshape(1).astype(jnp.float32)

    out = pl.pallas_call(
        _conv1x1_to1_kernel,
        out_shape=jax.ShapeDtypeStruct((B, 1, Mp), jnp.float32),
        grid=(B, Mp // bm),
        in_specs=[
            pl.BlockSpec((None, C, bm), lambda bb, mm: (bb, 0, mm)),
            pl.BlockSpec((C, 1), lambda bb, mm: (0, 0)),
            pl.BlockSpec(memory_space=pltpu.MemorySpace.SMEM),
        ],
        out_specs=pl.BlockSpec((None, 1, bm), lambda bb, mm: (bb, 0, mm)),
        compiler_params=pltpu.CompilerParams(
            dimension_semantics=("parallel", "parallel")),
    )(x, w2, b1)
    return out[:, :, :M].reshape(B, 1, H, W)


# ----------------------------------------------------------------------------
# Kernel 2: single-channel ConvTranspose2d + fused crop.
#   x_ref : (Hp, Wp)  zero-dilated, edge-padded input plane (one batch element)
#   w_ref : (K, K)    spatially-flipped transpose-conv weights (SMEM)
#   o_ref : (Hout, Wout)  = cropped region of the full deconv output
# ----------------------------------------------------------------------------
def _deconv_crop_kernel(x_ref, w_ref, o_ref, *, K, roff, coff, Hout, Wout):
    acc = jnp.zeros((Hout, Wout), jnp.float32)
    for kh in range(K):
        for kw in range(K):
            tap = x_ref[roff + kh: roff + kh + Hout,
                        coff + kw: coff + kw + Wout]
            acc = acc + w_ref[kh, kw] * tap
    o_ref[...] = acc


def deconv1ch_crop(y_nchw, wt, *, stride, pad, crop_offset, out_h, out_w):
    """ConvTranspose2d(1->1, K, stride, pad, bias=False) followed by a fused
    spatial crop: out[b,0,i,j] = full_deconv[b,0,i+crop_offset,j+crop_offset]."""
    B, _, H, W = y_nchw.shape
    K = int(wt.shape[0])
    y = y_nchw.reshape(B, H, W).astype(jnp.float32)

    # zero-dilation (stride insertion) + edge padding of (K-1-pad) -- layout glue.
    Hd = (H - 1) * stride + 1
    Wd = (W - 1) * stride + 1
    xd = jnp.zeros((B, Hd, Wd), jnp.float32).at[:, ::stride, ::stride].set(y)
    padv = K - 1 - pad
    if padv >= 0:
        xp = jnp.pad(xd, ((0, 0), (padv, padv), (padv, padv)))
    else:
        xp = xd[:, -padv:Hd + padv, -padv:Wd + padv]
    Hp, Wp = int(xp.shape[1]), int(xp.shape[2])

    Ho_full = (H - 1) * stride - 2 * pad + K
    Wo_full = (W - 1) * stride - 2 * pad + K
    assert crop_offset + out_h <= Ho_full and crop_offset + out_w <= Wo_full, (
        "crop window exceeds the transposed-conv output")

    wflip = wt[::-1, ::-1].astype(jnp.float32)     # correlation form of deconv

    kernel = functools.partial(_deconv_crop_kernel, K=K, roff=crop_offset,
                               coff=crop_offset, Hout=out_h, Wout=out_w)
    out = pl.pallas_call(
        kernel,
        out_shape=jax.ShapeDtypeStruct((B, out_h, out_w), jnp.float32),
        grid=(B,),
        in_specs=[
            pl.BlockSpec((None, Hp, Wp), lambda bb: (bb, 0, 0)),
            pl.BlockSpec(memory_space=pltpu.MemorySpace.SMEM),
        ],
        out_specs=pl.BlockSpec((None, out_h, out_w), lambda bb: (bb, 0, 0)),
        compiler_params=pltpu.CompilerParams(
            dimension_semantics=("parallel",)),
    )(xp, wflip)
    return out.reshape(B, 1, out_h, out_w)


# ----------------------------------------------------------------------------
# SideOutputCrop module (params + forward)
# ----------------------------------------------------------------------------
def make_side_output_crop_params(key, num_output, kernel_sz=None, stride=None,
                                 upconv_pad=0, do_crops=True):
    k1, k2, k3 = jax.random.split(key, 3)
    params = {
        "conv_w": jax.random.normal(k1, (num_output,), jnp.float32)
                  * (1.0 / math.sqrt(num_output)),
        "conv_b": jax.random.normal(k2, (1,), jnp.float32) * 0.1,
        "kernel_sz": kernel_sz,
        "stride": stride,
        "upconv_pad": upconv_pad,
        "do_crops": do_crops,
    }
    if kernel_sz is not None:
        params["up_w"] = jax.random.normal(
            k3, (kernel_sz, kernel_sz), jnp.float32) * (1.0 / kernel_sz)
    return params


def side_output_crop_forward(params, res, reference=None):
    # Conv2d(num_output -> 1, k=1, bias=True)
    y = conv1x1_to1(res, params["conv_w"], params["conv_b"])

    K = params["kernel_sz"]
    if K is None:                       # no upsample branch
        return y

    stride = params["stride"]
    pad = params["upconv_pad"]
    B, _, H, W = y.shape
    Ho = (H - 1) * stride - 2 * pad + K
    Wo = (W - 1) * stride - 2 * pad + K

    if params["do_crops"]:
        assert reference is not None, "do_crops=True requires a reference tensor"
        off = K // 4
        out_h = int(reference.shape[2])
        out_w = int(reference.shape[3])
    else:                               # MyIdentity: full deconv output
        off = 0
        out_h, out_w = Ho, Wo

    return deconv1ch_crop(y, params["up_w"], stride=stride, pad=pad,
                          crop_offset=off, out_h=out_h, out_w=out_w)


# ----------------------------------------------------------------------------
# Pure-numpy reference (independent scatter-form transposed conv)
# ----------------------------------------------------------------------------
def _reference_numpy(res, params, reference):
    res = np.asarray(res, np.float64)
    w1 = np.asarray(params["conv_w"], np.float64)
    b1 = float(np.asarray(params["conv_b"])[0])
    y = np.einsum("bchw,c->bhw", res, w1) + b1
    K = params["kernel_sz"]
    if K is None:
        return y[:, None]
    s = params["stride"]
    pad = params["upconv_pad"]
    wt = np.asarray(params["up_w"], np.float64)
    B, H, W = y.shape
    Ho = (H - 1) * s - 2 * pad + K
    Wo = (W - 1) * s - 2 * pad + K
    out = np.zeros((B, Ho, Wo), np.float64)
    for b in range(B):
        for i in range(H):
            for j in range(W):
                for kh in range(K):
                    for kw in range(K):
                        oh = i * s - pad + kh
                        ow = j * s - pad + kw
                        if 0 <= oh < Ho and 0 <= ow < Wo:
                            out[b, oh, ow] += y[b, i, j] * wt[kh, kw]
    if params["do_crops"]:
        off = K // 4
        rh, rw = reference.shape[2], reference.shape[3]
        out = out[:, off:off + rh, off:off + rw]
    return out[:, None]


# ----------------------------------------------------------------------------
# Main
# ----------------------------------------------------------------------------
if __name__ == "__main__":
    key = jax.random.PRNGKey(0)
    k_param, k_res, k_ref = jax.random.split(key, 3)

    num_output = 32
    B, H, W = 2, 8, 8                 # low-res backbone side feature
    ref_shape = (B, 3, 16, 16)        # "data" reference that defines the crop size

    params = make_side_output_crop_params(
        k_param, num_output, kernel_sz=4, stride=2, upconv_pad=0, do_crops=True)

    res = jax.random.normal(k_res, (B, num_output, H, W), jnp.float32)
    reference = jax.random.normal(k_ref, ref_shape, jnp.float32)

    # upsample + crop path
    out = side_output_crop_forward(params, res, reference)
    out = jax.block_until_ready(out)
    assert out.shape == (B, 1, 16, 16), out.shape

    ref_out = _reference_numpy(res, params, reference)
    np.testing.assert_allclose(np.asarray(out), ref_out, rtol=1e-4, atol=1e-4)

    # no-upsample path (kernel_sz=None) just exercises the 1x1 conv kernel
    params_plain = make_side_output_crop_params(k_param, num_output)
    out_plain = jax.block_until_ready(side_output_crop_forward(params_plain, res))
    assert out_plain.shape == (B, 1, H, W), out_plain.shape

    ref_plain = _reference_numpy(res, params_plain, None)
    np.testing.assert_allclose(np.asarray(out_plain), ref_plain,
                               rtol=1e-4, atol=1e-4)

    print("KERNEL_OK")
</pallas_src>

<mosaic_0001>
module attributes {stable_mosaic.version = 11 : i64} {
  func.func @_conv1x1_to1_kernel(%arg0: i32, %arg1: i32, %arg2: memref<1x32x128xf32, #tpu.memory_space<vmem>>, %arg3: memref<32x1xf32, #tpu.memory_space<vmem>>, %arg4: memref<1xf32, #tpu.memory_space<smem>>, %arg5: memref<1x1x128xf32, #tpu.memory_space<vmem>>) attributes {dimension_semantics = [#tpu.dimension_semantics<parallel>, #tpu.dimension_semantics<parallel>], iteration_bounds = array<i64: 2, 1>, scalar_prefetch = 0 : i64, scratch_operands = 0 : i64, tpu.core_type = #tpu.core_type<tc>, window_params = [{transform_indices = @transform_0, window_bounds = array<i64: 1, 32, 128>}, {pipeline_mode = #tpu.pipeline_mode<synchronous>, transform_indices = @transform_1, window_bounds = array<i64: 32, 1>}, {transform_indices = @transform_2, window_bounds = array<i64: 1>}, {transform_indices = @transform_3, window_bounds = array<i64: 1, 1, 128>}]} {
    %c0 = arith.constant 0 : index
    %c0_0 = arith.constant 0 : index
    %c0_1 = arith.constant 0 : index
    %0 = vector.load %arg2[%c0, %c0_0, %c0_1] : memref<1x32x128xf32, #tpu.memory_space<vmem>>, vector<1x32x128xf32>
    %1 = vector.shape_cast %0 : vector<1x32x128xf32> to vector<32x128xf32>
    %c0_2 = arith.constant 0 : index
    %c0_3 = arith.constant 0 : index
    %2 = vector.load %arg3[%c0_2, %c0_3] : memref<32x1xf32, #tpu.memory_space<vmem>>, vector<32x1xf32>
    %3 = vector.broadcast %2 : vector<32x1xf32> to vector<32x128xf32>
    %4 = arith.mulf %1, %3 : vector<32x128xf32>
    %cst = arith.constant dense<0.000000e+00> : vector<128xf32>
    %5 = vector.multi_reduction <add>, %4, %cst [0] : vector<32x128xf32> to vector<128xf32>
    %6 = vector.shape_cast %5 : vector<128xf32> to vector<1x128xf32>
    %c0_4 = arith.constant 0 : index
    %7 = memref.load %arg4[%c0_4] : memref<1xf32, #tpu.memory_space<smem>>
    %8 = vector.broadcast %7 : f32 to vector<1x128xf32>
    %9 = arith.addf %6, %8 : vector<1x128xf32>
    %c0_5 = arith.constant 0 : index
    %c0_6 = arith.constant 0 : index
    %c0_7 = arith.constant 0 : index
    %10 = vector.load %arg5[%c0_5, %c0_6, %c0_7] : memref<1x1x128xf32, #tpu.memory_space<vmem>>, vector<1x1x128xf32>
    %11 = vector.shape_cast %10 : vector<1x1x128xf32> to vector<1x128xf32>
    %12 = vector.shape_cast %9 : vector<1x128xf32> to vector<1x1x128xf32>
    tpu.vector_store %arg5[%c0_5, %c0_6, %c0_7], %12 {strides = array<i32>} : memref<1x1x128xf32, #tpu.memory_space<vmem>>, vector<1x1x128xf32>,
    return
  }
  func.func @transform_0(%arg0: i32, %arg1: i32) -> (i32, i32, i32) {
    %c0_i32 = arith.constant 0 : i32
    %c0_i32_0 = arith.constant 0 : i32
    return %arg0, %c0_i32, %arg1 : i32, i32, i32
  }
  func.func @transform_1(%arg0: i32, %arg1: i32) -> (i32, i32) {
    %c0_i32 = arith.constant 0 : i32
    %c0_i32_0 = arith.constant 0 : i32
    %c0_i32_1 = arith.constant 0 : i32
    return %c0_i32, %c0_i32_0 : i32, i32
  }
  func.func @transform_2(%arg0: i32, %arg1: i32) -> i32 {
    %c0_i32 = arith.constant 0 : i32
    %c0_i32_0 = arith.constant 0 : i32
    return %c0_i32 : i32
  }
  func.func @transform_3(%arg0: i32, %arg1: i32) -> (i32, i32, i32) {
    %c0_i32 = arith.constant 0 : i32
    %c0_i32_0 = arith.constant 0 : i32
    return %arg0, %c0_i32, %arg1 : i32, i32, i32
  }
}

</mosaic_0001>

<bundles_post_ra>
// kernel: tpu_custom_call.1
= control target key start
LH: loop header
LB: loop body
LE: loop exit
PB: predicated region body
PF: predicated region fallthrough
CT: control target
= control target key end

     0   :  { %s705_s0 = inlined_call_operand.hbm [shape: f32[2,32,128], index: 0, kind: input, shape index: {}]   ;;  %s706_s1 = inlined_call_operand.vmem [shape: f32[32,1], index: 1, kind: input, shape index: {}]   ;;  %s707_s2 = inlined_call_operand.<no memory space> [shape: f32[1], index: 2, kind: input, shape index: {}]   ;;  %s708_s3 = inlined_call_operand.hbm [shape: f32[2,1,128], index: 3, kind: output, shape index: {}]  }
   0x1   :  { %8 = sst [smem:[#allocation2]] %s707_s2 }
   0x2   :  { %9 = vsyncpa [#allocation4], 0 }
   0x3   :  { %11 = vsyncpa [#allocation4 + $0x1], 0 }
   0x4   :  { %12 = vsyncpa [#allocation5], 0 }
   0x5   :  { %14 = vsyncpa [#allocation5 + $0x1], 0  ;;  %s560_s14 = smov 0   ;;  %s562_s15 = smov 0  }
   0x6   :  { %s564_s16 = smov 0   ;;  %s566_s17 = smov 0  }
   0x7   :  { %s568_s18 = smov 0   ;;  %s570_s19 = smov 0  }
   0x8 LB: > { %s342_s2 = sadd.s32 4294967295, %s530_s19   ;;  %s343_s20 = sadd.s32 4294967294, %s530_s19   ;;  %s530_s19 = sphi %s570_s19, %s20_s19   ;;  %s526_s18 = sphi %s568_s18, %s719_s18   ;;  %s522_s17 = sphi %s566_s17, %s718_s17   ;;  %s518_s16 = sphi %s564_s16, %s717_s16   ;;  %s514_s15 = sphi %s562_s15, %s716_s15   ;;  %s510_s14 = sphi %s560_s14, %s715_s14  }
   0x9   : > { %s32_s21 = sadd.s32 1, %s526_s18  ;;  %s41_s22 = sadd.s32 1, %s518_s16 }
   0xa   : > { %p34_p0 = scmp.ge.s32.totalorder %s32_s21, 2  ;;  %p48_p1 = scmp.ne.s32.totalorder %s518_s16, %s514_s15 }
   0xb   : > { %p49_p2 = scmp.eq.s32.totalorder %s530_s19, 0  ;;  %p54_p3 = scmp.ne.s32.totalorder %s514_s15, %s510_s14 }
   0xc   : > { %s721_s21 = smov (%p34_p0, %s32_s21), 0  ;;  %p55_p5 = scmp.eq.s32.totalorder %s342_s2, 0 }
   0xd   : > { %p601_p4 = por %p49_p2, %p48_p1  ;;  %s36_s24 = ssub.s32 %s526_s18, %s721_s21 }
   0xe   : > { %p122_p6 = scmp.eq.s32.totalorder %s342_s2, 1  ;;  %p39_p7 = scmp.eq.s32.totalorder %s36_s24, 0 }
   0xf   : > { %p607_p8 = por %p55_p5, %p54_p3  ;;  %p128_p10 = scmp.eq.s32.totalorder %s343_s20, 1 }
  0x10   : > { %p611_p9 = por %p122_p6, %p48_p1  ;;  %p367_p13 = scmp.lt.s32.totalorder %s530_s19, 2 }
  0x11   : > { %s616_s27 = scalar_select %p39_p7, %s518_s16, %s41_s22  }
  0x12   : > { %p618_p11 = por %p128_p10, %p54_p3  ;;  %s154_s29 = sand.u32 1, %s518_s16  }
  0x13   : > { %s346_s30 = sshll.u32 %s154_s29, 5  ;;  %s354_s4 = sshll.u32 %s526_s18, 9 }
  0x14   : > { %s165_s7 = scalar_lea.hbm %s705_s0, %s354_s4  ;;  %s158_s8 = scalar_lea.vmem [#allocation3], %s346_s30 }
  0x15   : > { %s166_s9 = sshll.u32 %s158_s8, 4  ;;  %p631_p0 = pnand %p367_p13, %p601_p4  ;;  %s167_s9 = int_to_ptr.vmem [resolvable:$true] %s166_s9 }
  0x16   : > { %p349_p1 = scmp.ge.s32.totalorder %s530_s19, 1  ;;  %s155_s11 = scalar_lea.sflag [#allocation4], %s154_s29 }
  0x17   : > { %p424_p2 = pneg %p631_p0  ;;  %s435_s12 = scalar_lea.vmem %s167_s9, 512 }
  0x18   : > { %p436_p3 = scmp.ne.s32.totalorder %s167_s9, %s435_s12  ;;  %s532_s13 = smov [#allocation3]  }
  0x19   : > { %s440_s2 = sshll.u32 %s532_s13, 4  ;;  %s441_s2 = int_to_ptr.vmem [resolvable:$false] %s440_s2 }
  0x1a   : > { %p438_p5 = pnand %p436_p3, %p424_p2  ;;  %s442_s20 = scalar_lea.vmem %s441_s2, 1024 }
  0x1b   : > { %p443_p7 = scmp.lt.s32.totalorder %s167_s9, %s441_s2  ;;  %p444_p10 = scmp.lt.s32.totalorder %s442_s20, %s435_s12 }
  0x1c   : > { %p439_p6 = pneg %p438_p5 }
  0x1d   : > { %p445_p12 = por %p444_p10, %p443_p7 }
  0x1f   : > { %p446_p4 = pnand %p445_p12, %p439_p6 }
  0x21   : > { %449 = shalt.err (!%p446_p4)
}
  0x22   : > { %s533_s22 = smov 128   ;;  %s534_s23 = smov 8  }
  0x23   : > { %362 = dma.hbm_to_vmem [thread:$0]  (!%p631_p0), %s165_s7, 512, %s167_s9, %s155_s11, %s533_s22, %s533_s22, %s534_s23  }
  0x24   : > { %p174_p13 = scmp.lt.s32.totalorder %s530_s19, 3 }
  0x26   : > { %p175_p2 = pnand %p349_p1, %p174_p13 }
  0x27   : > { %s644_s24 = sand.u32 (!%p175_p2), 1, %s514_s15  }
  0x28   : > { %178 = sbr.rel (%p175_p2) target bundleno = 211 (0xd3), region = 32  ;;  %s350_s29 = sshll.u32 (!%p175_p2), %s644_s24, 5 }
  0x29   : > { %s181_s30 = scalar_lea.sflag (!%p175_p2), [#allocation4], %s644_s24  ;;  %s184_s4 = scalar_lea.vmem (!%p175_p2), [#allocation3], %s350_s29 }
  0x2d   : > { %501 = dma.done.wait (%p607_p8), %s181_s30, 512  }
  0x2e   : > { %503 = vsyncadd (%p607_p8), %s181_s30, 4294966784  ;;  %v535_v0 = vmov 0   ;;  %v212_v1 = vld [vmem:[%s706_s1 + $0x10] sm:$0xff]  ;;  %v210_v2 = vld [vmem:[%s706_s1] sm:$0xff]  ;;  %s247_s12 = sld [smem:[#allocation2]]  ;;  %s351_s13 = sshll.u32 %s522_s17, 4 }
  0x2f   : > { %421 = vset.pattern.permute.xlu1 %v535_v0  ;;  %420 = vset.pattern.permute.xlu0 %v535_v0  ;;  %v213_v3 = vld [vmem:[%s706_s1 + $0x18] sm:$0xff]  ;;  %v211_v4 = vld [vmem:[%s706_s1 + $0x8] sm:$0xff]  ;;  %v206_v7 = vld [vmem:[%s184_s4] sm:$0xff]  ;;  %s205_s2 = scalar_lea.vmem [#allocation6], %s644_s24  ;;  %s263_s29 = scalar_lea.hbm %s708_s3, %s351_s13 }
  0x30   : > { %226 = vperm.xlu1 %421, %v212_v1   ;;  %216 = vperm.xlu0 %420, %v210_v2   ;;  %v207_v8 = vld [vmem:[%s184_s4 + $0x8] sm:$0xff]  ;;  %v208_v9 = vld [vmem:[%s184_s4 + $0x10] sm:$0xff]  ;;  %v209_v14 = vld [vmem:[%s184_s4 + $0x18] sm:$0xff]  ;;  %s265_s20 = sshll.u32 %s205_s2, 4  ;;  %s252_s30 = scalar_lea.sflag [#allocation5], %s644_s24  ;;  %s266_s20 = int_to_ptr.vmem [resolvable:$true] %s265_s20 }
  0x31   : > { %s450_s4 = scalar_lea.vmem %s266_s20, 16  ;;  %s536_s5 = smov [#allocation6]  }
  0x32   : > { %p451_p8 = scmp.ne.s32.totalorder %s266_s20, %s450_s4  ;;  %s454_s6 = sshll.u32 %s536_s5, 4  ;;  %s455_s6 = int_to_ptr.vmem [resolvable:$false] %s454_s6 }
  0x33   : > { %s456_s17 = scalar_lea.vmem %s455_s6, 32  ;;  %p457_p1 = scmp.lt.s32.totalorder %s266_s20, %s455_s6 }
  0x34   : > { %231 = vperm.xlu1 %421, %v213_v3   ;;  %221 = vperm.xlu0 %420, %v211_v4   ;;  %v248_v25 = vstv %s247_s12  ;;  %p452_p12 = pnand %p451_p8, %p611_p9  ;;  %p458_p3 = scmp.lt.s32.totalorder %s456_s17, %s450_s4 }
  0x36   : > { %p453_p0 = pneg %p452_p12  ;;  %p459_p5 = por %p458_p3, %p457_p1 }
  0x38   : > { %p460_p6 = pnand %p459_p5, %p453_p0 }
  0xab   : > { %v227_v5 = vpop.permute.xlu1 %226  ;;  %v217_v6 = vpop.permute.xlu0 %216 }
  0xac   : > { %v234_v11 = vmul.f32 %v217_v6, %v206_v7  ;;  %v236_v15 = vmul.f32 %v227_v5, %v208_v9 }
  0xaf   : > { %v222_v10 = vpop.permute.xlu0 %221  ;;  %v232_v13 = vpop.permute.xlu1 %231 }
  0xb0   : > { %v235_v12 = vmul.f32 %v222_v10, %v207_v8  ;;  %v237_v17 = vmul.f32 %v232_v13, %v209_v14 }
  0xb2   : > { %v238_v16 = vadd.f32 %v235_v12, %v234_v11 }
  0xb4   : > { %v239_v18 = vadd.f32 %v238_v16, %v236_v15 }
  0xb6   : > { %v240_v19 = vadd.f32 %v239_v18, %v237_v17 }
  0xb8   : > { %v241_v20 = vrot.slane %v240_v19, 4 }
  0xba   : > { %v242_v21 = vadd.f32 %v241_v20, %v240_v19 }
  0xbc   : > { %v243_v22 = vrot.slane %v242_v21, 2 }
  0xbe   : > { %v244_v23 = vadd.f32 %v243_v22, %v242_v21 }
  0xc0   : > { %v245_v24 = vrot.slane %v244_v23, 1 }
  0xc2   : > { %v246_v26 = vadd.f32 %v245_v24, %v244_v23 }
  0xc4   : > { %v249_v27 = vadd.f32 %v248_v25, %v246_v26 }
  0xc6   : > { %250 = vst [vmem:[%s205_s2] sm:$0x1] %v249_v27 }
  0xc7   : > { %463 = shalt.err (!%p460_p6)
}
  0xc8   : > { %s464_s7 = scalar_lea.hbm %s263_s29, 16  ;;  %s468_s9 = scalar_lea.hbm %s708_s3, 32 }
  0xc9   : > { %p465_p7 = scmp.ne.s32.totalorder %s263_s29, %s464_s7  ;;  %p469_p13 = scmp.lt.s32.totalorder %s263_s29, %s708_s3 }
  0xca   : > { %p470_p2 = scmp.lt.s32.totalorder %s468_s9, %s464_s7 }
  0xcb   : > { %p466_p10 = pnand %p465_p7, %p611_p9 }
  0xcc   : > { %p471_p8 = por %p470_p2, %p469_p13 }
  0xcd   : > { %p467_p4 = pneg %p466_p10 }
  0xcf   : > { %p472_p12 = pnand %p471_p8, %p467_p4 }
  0xd1   : > { %475 = shalt.err (!%p472_p12)
}
  0xd2   : > { %357 = dma.vmem_to_hbm [thread:$0]  (%p611_p9), %s266_s20, 16, %s263_s29, %s252_s30  }
  0xd3 PF: > { %s277_s25 = sand.u32 1, %s510_s14   ;;  %p714_p0 = scmp.ge.s32.totalorder %s530_s19, 2 }
  0xd4   : > { %s278_s12 = scalar_lea.sflag [#allocation5], %s277_s25 }
  0xd5   : > { %p364_p1 = pnand %p714_p0, %p618_p11 }
  0xd7   : > { %p365_p3 = pneg %p364_p1 }
  0xd9   : > { %505 = dma.done.wait (%p365_p3), %s278_s12, 16  }
  0xda   : > { %507 = vsyncadd (%p365_p3), %s278_s12, 4294967280  ;;  %s20_s19 = sadd.s32 1, %s530_s19   ;;  %s715_s14 = smov %s514_s15 }
  0xdb   : > { %p17_p5 = scmp.ge.s32.totalorder %s20_s19, 4   ;;  %s716_s15 = smov %s518_s16 }
  0xdc   : > { %s717_s16 = smov %s616_s27  ;;  %s718_s17 = smov %s526_s18 }
  0xdd   : > { %s719_s18 = smov %s721_s21  ;;  %19 = sbr.rel (!%p17_p5) target bundleno = 8 (0x8), region = 77 }
  0xe2   :  { %282 = vsyncpa [#allocation4], 1 }
  0xe3   :  { %284 = vsyncpa [#allocation4 + $0x1], 1 }
  0xe4   :  { %285 = vsyncpa [#allocation5], 1 }
  0xe5   :  { %287 = vsyncpa [#allocation5 + $0x1], 1 }

</bundles_post_ra>
